<compile_context>
chip_gen: v7x
topology: tpu7x:2x2x1
jax: 0.10.0
libtpu: 0.0.40
codegen_flags: <defaults>
</compile_context>

<pallas_src>
import functools

import jax
import jax.numpy as jnp
from jax.experimental import pallas as pl
from jax.experimental.pallas import tpu as pltpu


def _epe_mask_kernel(eps, pred_ref, label_ref, mask_ref, out_ref, acc_ref):
    """pred_ref/label_ref: (1, C, Pt) f32 VMEM blocks; mask_ref: (1, 1, Pt) f32.
    out_ref: (1, 1, 128) f32 VMEM block (per-sample loss, broadcast over lanes).
    acc_ref: SMEM (2,) f32 scratch -> [numerator, denominator] accumulators."""
    p = pl.program_id(1)

    @pl.when(p == 0)
    def _init():
        acc_ref[0] = jnp.float32(0.0)
        acc_ref[1] = jnp.float32(0.0)

    d = pred_ref[0] - label_ref[0]                         # (C, Pt)
    sq = jnp.sum(d * d, axis=0, keepdims=True)             # (1, Pt)  sum over channels
    epe = jnp.sqrt(sq + jnp.float32(eps))                  # (1, Pt)
    m = mask_ref[0]                                        # (1, Pt)

    acc_ref[0] += jnp.sum(epe * m)                         # masked EPE sum
    acc_ref[1] += jnp.sum(m)                               # mask sum

    @pl.when(p == pl.num_programs(1) - 1)
    def _finalize():
        val = acc_ref[0] / acc_ref[1]
        out_ref[...] = jnp.full((1, 1, 128), val, jnp.float32)


def _choose_pixel_tile(hw: int, c: int, target_bytes: int = 2 * 1024 * 1024) -> int:
    """Largest pixel tile keeping one (1,C,Pt) f32 input block under ~target_bytes,
    so 2 inputs x 2 pipeline buffers stays well inside even v7x's 64 MiB VMEM."""
    if hw * c * 4 <= target_bytes:
        return hw                                  # single tile covers the pixel axis
    max_pt = max(128, (target_bytes // (c * 4)) // 128 * 128)
    pt = max_pt
    while pt >= 128:
        if hw % pt == 0:
            return pt
        pt -= 128
    return hw                                      # fallback: full extent (always legal)


def epe_loss_with_mask(pred, label, mask, eps: float = 1e-8, pixel_tile: int | None = None):
    """pred, label: (N, C, H, W); mask: (N, 1, H, W) or (N, H, W). Returns (N,) f32."""
    N, C, H, W = pred.shape
    assert label.shape == pred.shape
    hw = H * W

    if mask.ndim == 4:
        assert mask.shape == (N, 1, H, W), mask.shape
        mask3 = mask.reshape(N, 1, hw)
    else:
        assert mask.shape == (N, H, W), mask.shape
        mask3 = mask.reshape(N, 1, hw)

    pred3 = pred.reshape(N, C, hw).astype(jnp.float32)
    label3 = label.reshape(N, C, hw).astype(jnp.float32)
    mask3 = mask3.astype(jnp.float32)

    if pixel_tile is None:
        pixel_tile = _choose_pixel_tile(hw, C)
    assert hw % pixel_tile == 0, (hw, pixel_tile)
    num_p = hw // pixel_tile

    kernel = functools.partial(_epe_mask_kernel, float(eps))

    cost = pl.CostEstimate(
        flops=N * hw * (3 * C + 4),
        transcendentals=N * hw,                              # one sqrt per pixel
        bytes_accessed=4 * ((2 * C + 1) * N * hw + N * 128),
    )

    out = pl.pallas_call(
        kernel,
        out_shape=jax.ShapeDtypeStruct((N, 1, 128), jnp.float32),
        grid_spec=pltpu.PrefetchScalarGridSpec(
            num_scalar_prefetch=0,
            grid=(N, num_p),
            in_specs=[
                pl.BlockSpec((1, C, pixel_tile), lambda n, p: (n, 0, p)),
                pl.BlockSpec((1, C, pixel_tile), lambda n, p: (n, 0, p)),
                pl.BlockSpec((1, 1, pixel_tile), lambda n, p: (n, 0, p)),
            ],
            out_specs=pl.BlockSpec((1, 1, 128), lambda n, p: (n, 0, 0)),
            scratch_shapes=[pltpu.SMEM((2,), jnp.float32)],
        ),
        compiler_params=pltpu.CompilerParams(
            dimension_semantics=("parallel", "arbitrary")),
        cost_estimate=cost,
    )(pred3, label3, mask3)

    return out[:, 0, 0]                                      # (N,)


def reference_epe_loss_with_mask(pred, label, mask, eps: float = 1e-8):
    """Pure-JAX reference mirroring the PyTorch module (q=None path)."""
    d = pred - label
    per_pix = jnp.sqrt(jnp.sum(d * d, axis=1) + eps)          # (N, H, W)
    per_pix = per_pix * mask[:, 0]
    num = per_pix.reshape(per_pix.shape[0], -1).sum(axis=1)
    den = mask.reshape(mask.shape[0], -1).sum(axis=1)
    return num / den


if __name__ == "__main__":
    key = jax.random.PRNGKey(0)
    k1, k2, k3 = jax.random.split(key, 3)

    # Flow-like NCHW inputs: batch=2, channels=4, spatial=16; mask is (N,1,H,W).
    N, C, H, W = 2, 4, 16, 16
    pred = jax.random.normal(k1, (N, C, H, W), dtype=jnp.float32)
    label = jax.random.normal(k2, (N, C, H, W), dtype=jnp.float32)
    mask = (jax.random.uniform(k3, (N, 1, H, W)) > 0.3).astype(jnp.float32)

    out = jax.block_until_ready(epe_loss_with_mask(pred, label, mask))
    ref = jax.block_until_ready(reference_epe_loss_with_mask(pred, label, mask))
    assert out.shape == (N,)
    assert jnp.allclose(out, ref, atol=1e-5, rtol=1e-5), (out, ref)

    # Also exercise the multi-tile accumulation path (2 pixel tiles of 128).
    out2 = jax.block_until_ready(epe_loss_with_mask(pred, label, mask, pixel_tile=128))
    assert jnp.allclose(out2, ref, atol=1e-5, rtol=1e-5), (out2, ref)

    print("KERNEL_OK")
</pallas_src>

<mosaic_0001>
module attributes {stable_mosaic.version = 11 : i64} {
  func.func @_epe_mask_kernel(%arg0: i32, %arg1: i32, %arg2: memref<1x4x256xf32, #tpu.memory_space<vmem>>, %arg3: memref<1x4x256xf32, #tpu.memory_space<vmem>>, %arg4: memref<1x1x256xf32, #tpu.memory_space<vmem>>, %arg5: memref<1x1x128xf32, #tpu.memory_space<vmem>>, %arg6: memref<2xf32, #tpu.memory_space<smem>>) attributes {dimension_semantics = [#tpu.dimension_semantics<parallel>, #tpu.dimension_semantics<arbitrary>], iteration_bounds = array<i64: 2, 1>, scalar_prefetch = 0 : i64, scratch_operands = 1 : i64, tpu.core_type = #tpu.core_type<tc>, window_params = [{transform_indices = @transform_0, window_bounds = array<i64: 1, 4, 256>}, {transform_indices = @transform_1, window_bounds = array<i64: 1, 4, 256>}, {transform_indices = @transform_2, window_bounds = array<i64: 1, 1, 256>}, {transform_indices = @transform_3, window_bounds = array<i64: 1, 1, 128>}]} {
    %c0_i32 = arith.constant 0 : i32
    %0 = arith.cmpi eq, %arg1, %c0_i32 : i32
    %1 = arith.extui %0 : i1 to i32
    %c0_i32_0 = arith.constant 0 : i32
    %2 = arith.cmpi ne, %1, %c0_i32_0 : i32
    scf.if %2 {
      %cst_17 = arith.constant 0.000000e+00 : f32
      %c0_18 = arith.constant 0 : index
      %34 = memref.load %arg6[%c0_18] : memref<2xf32, #tpu.memory_space<smem>>
      memref.store %cst_17, %arg6[%c0_18] : memref<2xf32, #tpu.memory_space<smem>>
      %cst_19 = arith.constant 0.000000e+00 : f32
      %c1_20 = arith.constant 1 : index
      %35 = memref.load %arg6[%c1_20] : memref<2xf32, #tpu.memory_space<smem>>
      memref.store %cst_19, %arg6[%c1_20] : memref<2xf32, #tpu.memory_space<smem>>
    } else {
    }
    %c0 = arith.constant 0 : index
    %c0_1 = arith.constant 0 : index
    %c0_2 = arith.constant 0 : index
    %3 = vector.load %arg2[%c0, %c0_1, %c0_2] : memref<1x4x256xf32, #tpu.memory_space<vmem>>, vector<1x4x256xf32>
    %4 = vector.shape_cast %3 : vector<1x4x256xf32> to vector<4x256xf32>
    %c0_3 = arith.constant 0 : index
    %c0_4 = arith.constant 0 : index
    %c0_5 = arith.constant 0 : index
    %5 = vector.load %arg3[%c0_3, %c0_4, %c0_5] : memref<1x4x256xf32, #tpu.memory_space<vmem>>, vector<1x4x256xf32>
    %6 = vector.shape_cast %5 : vector<1x4x256xf32> to vector<4x256xf32>
    %7 = arith.subf %4, %6 : vector<4x256xf32>
    %8 = arith.mulf %7, %7 : vector<4x256xf32>
    %cst = arith.constant dense<0.000000e+00> : vector<256xf32>
    %9 = vector.multi_reduction <add>, %8, %cst [0] : vector<4x256xf32> to vector<256xf32>
    %10 = vector.shape_cast %9 : vector<256xf32> to vector<1x256xf32>
    %cst_6 = arith.constant 9.99999993E-9 : f32
    %11 = vector.broadcast %cst_6 : f32 to vector<1x256xf32>
    %12 = arith.addf %10, %11 : vector<1x256xf32>
    %13 = math.sqrt %12 : vector<1x256xf32>
    %c0_7 = arith.constant 0 : index
    %c0_8 = arith.constant 0 : index
    %c0_9 = arith.constant 0 : index
    %14 = vector.load %arg4[%c0_7, %c0_8, %c0_9] : memref<1x1x256xf32, #tpu.memory_space<vmem>>, vector<1x1x256xf32>
    %15 = vector.shape_cast %14 : vector<1x1x256xf32> to vector<1x256xf32>
    %c0_10 = arith.constant 0 : index
    %16 = memref.load %arg6[%c0_10] : memref<2xf32, #tpu.memory_space<smem>>
    %17 = arith.mulf %13, %15 : vector<1x256xf32>
    %18 = vector.shape_cast %17 : vector<1x256xf32> to vector<1x1x256xf32>
    %cst_11 = arith.constant dense<0.000000e+00> : vector<1xf32>
    %19 = vector.multi_reduction <add>, %18, %cst_11 [1, 2] : vector<1x1x256xf32> to vector<1xf32>
    %20 = vector.shape_cast %19 : vector<1xf32> to vector<1x1x1xf32>
    %21 = vector.extract %20[0, 0, 0] : f32 from vector<1x1x1xf32>
    %22 = arith.addf %16, %21 : f32
    %c0_12 = arith.constant 0 : index
    %23 = memref.load %arg6[%c0_12] : memref<2xf32, #tpu.memory_space<smem>>
    memref.store %22, %arg6[%c0_12] : memref<2xf32, #tpu.memory_space<smem>>
    %c1 = arith.constant 1 : index
    %24 = memref.load %arg6[%c1] : memref<2xf32, #tpu.memory_space<smem>>
    %25 = vector.shape_cast %15 : vector<1x256xf32> to vector<1x1x256xf32>
    %cst_13 = arith.constant dense<0.000000e+00> : vector<1xf32>
    %26 = vector.multi_reduction <add>, %25, %cst_13 [1, 2] : vector<1x1x256xf32> to vector<1xf32>
    %27 = vector.shape_cast %26 : vector<1xf32> to vector<1x1x1xf32>
    %28 = vector.extract %27[0, 0, 0] : f32 from vector<1x1x1xf32>
    %29 = arith.addf %24, %28 : f32
    %c1_14 = arith.constant 1 : index
    %30 = memref.load %arg6[%c1_14] : memref<2xf32, #tpu.memory_space<smem>>
    memref.store %29, %arg6[%c1_14] : memref<2xf32, #tpu.memory_space<smem>>
    %c0_i32_15 = arith.constant 0 : i32
    %31 = arith.cmpi eq, %arg1, %c0_i32_15 : i32
    %32 = arith.extui %31 : i1 to i32
    %c0_i32_16 = arith.constant 0 : i32
    %33 = arith.cmpi ne, %32, %c0_i32_16 : i32
    scf.if %33 {
      %c0_17 = arith.constant 0 : index
      %34 = memref.load %arg6[%c0_17] : memref<2xf32, #tpu.memory_space<smem>>
      %c1_18 = arith.constant 1 : index
      %35 = memref.load %arg6[%c1_18] : memref<2xf32, #tpu.memory_space<smem>>
      %36 = arith.divf %34, %35 : f32
      %37 = vector.broadcast %36 : f32 to vector<1x1x128xf32>
      %c0_19 = arith.constant 0 : index
      %c0_20 = arith.constant 0 : index
      %c0_21 = arith.constant 0 : index
      %38 = vector.load %arg5[%c0_19, %c0_20, %c0_21] : memref<1x1x128xf32, #tpu.memory_space<vmem>>, vector<1x1x128xf32>
      tpu.vector_store %arg5[%c0_19, %c0_20, %c0_21], %37 {strides = array<i32>} : memref<1x1x128xf32, #tpu.memory_space<vmem>>, vector<1x1x128xf32>,
    } else {
    }
    return
  }
  func.func @transform_0(%arg0: i32, %arg1: i32) -> (i32, i32, i32) {
    %c0_i32 = arith.constant 0 : i32
    %c0_i32_0 = arith.constant 0 : i32
    return %arg0, %c0_i32, %arg1 : i32, i32, i32
  }
  func.func @transform_1(%arg0: i32, %arg1: i32) -> (i32, i32, i32) {
    %c0_i32 = arith.constant 0 : i32
    %c0_i32_0 = arith.constant 0 : i32
    return %arg0, %c0_i32, %arg1 : i32, i32, i32
  }
  func.func @transform_2(%arg0: i32, %arg1: i32) -> (i32, i32, i32) {
    %c0_i32 = arith.constant 0 : i32
    %c0_i32_0 = arith.constant 0 : i32
    return %arg0, %c0_i32, %arg1 : i32, i32, i32
  }
  func.func @transform_3(%arg0: i32, %arg1: i32) -> (i32, i32, i32) {
    %c0_i32 = arith.constant 0 : i32
    %c0_i32_0 = arith.constant 0 : i32
    %c0_i32_1 = arith.constant 0 : i32
    return %arg0, %c0_i32, %c0_i32_0 : i32, i32, i32
  }
}

</mosaic_0001>

<bundles_post_ra>
// kernel: tpu_custom_call.1
= control target key start
LH: loop header
LB: loop body
LE: loop exit
PB: predicated region body
PF: predicated region fallthrough
CT: control target
= control target key end

     0   :  { %8 = vsyncpa [#allocation4], 0  ;;  %s1011_s0 = inlined_call_operand.hbm [shape: f32[2,4,256], index: 0, kind: input, shape index: {}]   ;;  %s1012_s1 = inlined_call_operand.hbm [shape: f32[2,4,256], index: 1, kind: input, shape index: {}]   ;;  %s1013_s2 = inlined_call_operand.vmem [shape: f32[2,1,256], index: 2, kind: input, shape index: {}]   ;;  %s1014_s3 = inlined_call_operand.hbm [shape: f32[2,1,128], index: 3, kind: output, shape index: {}]  }
   0x1   :  { %10 = vsyncpa [#allocation4 + $0x1], 0 }
   0x2   :  { %11 = vsyncpa [#allocation7], 0 }
   0x3   :  { %13 = vsyncpa [#allocation7 + $0x1], 0 }
   0x4   :  { %14 = vsyncpa [#allocation5], 0 }
   0x5   :  { %16 = vsyncpa [#allocation5 + $0x1], 0  ;;  %s785_s12 = smov 0   ;;  %s787_s13 = smov 0  }
   0x6   :  { %s789_s14 = smov 0   ;;  %s791_s15 = smov 0  }
   0x7   :  { %s793_s16 = smov 0   ;;  %s795_s17 = smov 0  }
   0x8 LB: > { %s514_s18 = sadd.s32 4294967295, %s760_s17   ;;  %s515_s19 = sadd.s32 4294967294, %s760_s17   ;;  %s760_s17 = sphi %s795_s17, %s22_s17   ;;  %s756_s16 = sphi %s793_s16, %s1034_s16   ;;  %s752_s15 = sphi %s791_s15, %s1033_s15   ;;  %s748_s14 = sphi %s789_s14, %s1032_s14   ;;  %s744_s13 = sphi %s787_s13, %s1031_s13   ;;  %s740_s12 = sphi %s785_s12, %s1030_s12  }
   0x9   : > { %s34_s20 = sadd.s32 1, %s756_s16  ;;  %s43_s21 = sadd.s32 1, %s748_s14 }
   0xa   : > { %p36_p0 = scmp.ge.s32.totalorder %s34_s20, 2  ;;  %p50_p1 = scmp.ne.s32.totalorder %s748_s14, %s744_s13 }
   0xb   : > { %p51_p2 = scmp.eq.s32.totalorder %s760_s17, 0  ;;  %p56_p3 = scmp.ne.s32.totalorder %s744_s13, %s740_s12 }
   0xc   : > { %s1036_s20 = smov (%p36_p0, %s34_s20), 0  ;;  %p57_p5 = scmp.eq.s32.totalorder %s514_s18, 0 }
   0xd   : > { %p826_p4 = por %p51_p2, %p50_p1  ;;  %s38_s23 = ssub.s32 %s756_s16, %s1036_s20 }
   0xe   : > { %p136_p6 = scmp.eq.s32.totalorder %s514_s18, 1  ;;  %p41_p7 = scmp.eq.s32.totalorder %s38_s23, 0 }
   0xf   : > { %p832_p8 = por %p57_p5, %p56_p3  ;;  %p142_p10 = scmp.eq.s32.totalorder %s515_s19, 1 }
  0x10   : > { %p836_p9 = por %p136_p6, %p50_p1  ;;  %p558_p13 = scmp.lt.s32.totalorder %s760_s17, 2 }
  0x11   : > { %s1018_s24 = scalar_select %p832_p8, 1, 0 }
  0x12   : > { %s1019_s25 = scalar_select %p836_p9, 1, 0 }
  0x13   : > { %s841_s26 = scalar_select %p41_p7, %s748_s14, %s43_s21  }
  0x14   : > { %p843_p11 = por %p142_p10, %p56_p3  ;;  %s850_s28 = sand.u32 1, %s748_s14  }
  0x15   : > { %s518_s29 = sshll.u32 %s850_s28, 3  ;;  %s533_s30 = sshll.u32 %s756_s16, 7 }
  0x16   : > { %s1020_s27 = scalar_select %p843_p11, 1, 0 }
  0x17   : > { %s859_s6 = scalar_lea.hbm %s1011_s0, %s533_s30  ;;  %s166_s7 = scalar_lea.vmem [#allocation3], %s518_s29 }
  0x18   : > { %s176_s8 = sshll.u32 %s166_s7, 4  ;;  %p867_p0 = pnand %p558_p13, %p826_p4  ;;  %s863_s8 = int_to_ptr.vmem [resolvable:$true] %s176_s8 }
  0x19   : > { %s163_s10 = scalar_lea.sflag [#allocation4], %s850_s28  ;;  %s614_s11 = scalar_lea.hbm %s859_s6, 128 }
  0x1a   : > { %p615_p3 = scmp.ne.s32.totalorder %s859_s6, %s614_s11  ;;  %p616_p5 = pneg %p867_p0 }
  0x1b   : > { %s619_s21 = scalar_lea.hbm %s1011_s0, 256  ;;  %p620_p4 = scmp.lt.u32.totalorder %s859_s6, %s1011_s0 }
  0x1c   : > { %p617_p6 = pnand %p616_p5, %p615_p3  ;;  %p621_p10 = scmp.lt.u32.totalorder %s619_s21, %s614_s11 }
  0x1d   : > { %p623_p12 = scmp.lt.u32.totalorder %s614_s11, %s859_s6 }
  0x1e   : > { %p618_p7 = pneg %p617_p6  ;;  %p622_p13 = por %p621_p10, %p620_p4 }
  0x20   : > { %p624_p1 = por %p623_p12, %p622_p13 }
  0x22   : > { %p625_p2 = pnand %p624_p1, %p618_p7 }
  0x24   : > { %628 = shalt.err (!%p625_p2)
}
  0x25   : > { %s629_s4 = scalar_lea.vmem %s863_s8, 128  ;;  %s762_s5 = smov [#allocation3]  }
  0x26   : > { %p630_p3 = scmp.ne.s32.totalorder %s863_s8, %s629_s4  ;;  %s634_s7 = sshll.u32 %s762_s5, 4  ;;  %s635_s7 = int_to_ptr.vmem [resolvable:$false] %s634_s7 }
  0x27   : > { %s636_s18 = scalar_lea.vmem %s635_s7, 256  ;;  %p637_p9 = scmp.lt.s32.totalorder %s863_s8, %s635_s7 }
  0x28   : > { %p632_p6 = pnand %p630_p3, %p616_p5  ;;  %p638_p4 = scmp.lt.s32.totalorder %s636_s18, %s629_s4 }
  0x2a   : > { %p633_p11 = pneg %p632_p6  ;;  %p639_p10 = por %p638_p4, %p637_p9 }
  0x2c   : > { %p640_p12 = pnand %p639_p10, %p633_p11 }
  0x2e   : > { %643 = shalt.err (!%p640_p12)
}
  0x2f   : > { %550 = dma.hbm_to_vmem [thread:$0]  (!%p867_p0), %s859_s6, 128, %s863_s8, %s163_s10  }
  0x30   : > { %p1022_p1 = scmp.lt.s32.totalorder %s760_s17, 3  ;;  %p1023_p2 = scmp.ge.s32.totalorder %s760_s17, 1 }
  0x31   : > { %s912_s22 = scalar_lea.hbm %s1012_s1, %s533_s30  ;;  %s187_s23 = scalar_lea.vmem [#allocation6], %s518_s29 }
  0x32   : > { %p903_p7 = pnand %p1023_p2, %p1022_p1  ;;  %s197_s4 = sshll.u32 %s187_s23, 4  ;;  %s198_s4 = int_to_ptr.vmem [resolvable:$true] %s197_s4 }
  0x33   : > { %s184_s6 = scalar_lea.sflag [#allocation7], %s850_s28  ;;  %s644_s8 = scalar_lea.hbm %s912_s22, 128 }
  0x34   : > { %s1024_s11 = scalar_select %p903_p7, 1, 0 }
  0x35   : > { %p645_p9 = scmp.ne.s32.totalorder %s912_s22, %s644_s8  ;;  %s649_s30 = scalar_lea.hbm %s1012_s1, 256 }
  0x36   : > { %p650_p3 = scmp.lt.u32.totalorder %s912_s22, %s1012_s1  ;;  %p651_p6 = scmp.lt.u32.totalorder %s649_s30, %s644_s8 }
  0x37   : > { %p647_p11 = pnand %p645_p9, %p616_p5  ;;  %p653_p10 = scmp.lt.u32.totalorder %s644_s8, %s912_s22 }
  0x38   : > { %p652_p4 = por %p651_p6, %p650_p3 }
  0x39   : > { %p648_p13 = pneg %p647_p11 }
  0x3a   : > { %p654_p12 = por %p653_p10, %p652_p4 }
  0x3c   : > { %p655_p1 = pnand %p654_p12, %p648_p13 }
  0x3e   : > { %658 = shalt.err (!%p655_p1)
}
  0x3f   : > { %s659_s28 = scalar_lea.vmem %s198_s4, 128  ;;  %s763_s29 = smov [#allocation6]  }
  0x40   : > { %p660_p2 = scmp.ne.s32.totalorder %s198_s4, %s659_s28  ;;  %s664_s19 = sshll.u32 %s763_s29, 4  ;;  %s665_s19 = int_to_ptr.vmem [resolvable:$false] %s664_s19 }
  0x41   : > { %s666_s21 = scalar_lea.vmem %s665_s19, 256  ;;  %p667_p8 = scmp.lt.s32.totalorder %s198_s4, %s665_s19 }
  0x42   : > { %p662_p9 = pnand %p660_p2, %p616_p5  ;;  %p668_p7 = scmp.lt.s32.totalorder %s666_s21, %s659_s28 }
  0x44   : > { %p663_p11 = pneg %p662_p9  ;;  %p669_p3 = por %p668_p7, %p667_p8 }
  0x46   : > { %p670_p6 = pnand %p669_p3, %p663_p11 }
  0x48   : > { %673 = shalt.err (!%p670_p6)
}
  0x49   : > { %553 = dma.hbm_to_vmem [thread:$0]  (!%p867_p0), %s912_s22, 128, %s198_s4, %s184_s6  }
  0x4a   : > { %p1025_p13 = scmp.ne.s32.totalorder %s1024_s11, 0 }
  0x4b   : > { %s939_s23 = sand.u32 (!%p1025_p13), 1, %s744_s13   ;;  %p1026_p5 = scmp.ne.s32.totalorder (!%p1025_p13), %s1018_s24, 0 }
  0x4c   : > { %218 = sbr.rel (%p1025_p13) target bundleno = 415 (0x19f), region = 32  ;;  %s525_s8 = sshll.u32 (!%p1025_p13), %s939_s23, 3 }
  0x4d   : > { %s221_s10 = scalar_lea.sflag (!%p1025_p13), [#allocation4], %s939_s23  ;;  %s224_s5 = scalar_lea.vmem (!%p1025_p13), [#allocation3], %s525_s8 }
  0x53   : > { %727 = dma.done.wait (%p1026_p5), %s221_s10, 128  }
  0x54   : > { %729 = vsyncadd (%p1026_p5), %s221_s10, 4294967168  ;;  %s230_s9 = scalar_lea.sflag [#allocation7], %s939_s23  ;;  %s233_s22 = scalar_lea.vmem [#allocation6], %s525_s8 }
  0x55   : > { %731 = dma.done.wait (%p1026_p5), %s230_s9, 128  }
  0x56   : > { %733 = vsyncadd (%p1026_p5), %s230_s9, 4294967168  ;;  %v287_v0 = vld [vmem:[%s224_s5] sm:$0xff]  ;;  %v288_v1 = vld [vmem:[%s233_s22] sm:$0xff]  ;;  %vm294_vm0 = vcmask 1043456   ;;  %p271_p8 = scmp.lt.s32.totalorder %s752_s15, 1  ;;  %v328_v20 = vlaneseq  ;;  %vm340_vm5 = vcmask 1040384  }
  0x57   : > { %v289_v2 = vsub.f32 %v287_v0, %v288_v1  ;;  %s530_s28 = sshll.u32 %s752_s15, 4  ;;  %s267_s29 = scalar_lea.vmem [#allocation8], %s939_s23 }
  0x58   : > { %s272_s24 = scalar_select %p271_p8, %s752_s15, 1  ;;  %v329_v22 = vshrl.u32 %v328_v20, 7 }
  0x59   : > { %v290_v3 = vmul.f32 %v289_v2, %v289_v2  ;;  %s396_s19 = sshll.u32 %s267_s29, 4  ;;  %s962_s9 = scalar_lea.hbm %s1014_s3, %s530_s28  ;;  %s964_s19 = int_to_ptr.vmem [resolvable:$true] %s396_s19 }
  0x5a   : > { %s527_s11 = sshll.u32 %s272_s24, 1  ;;  %v330_v23 = vsub.s32 0, %v329_v22  ;;  %v334_v25 = vsub.s32 1, %v329_v22  ;;  %s384_s22 = scalar_lea.sflag [#allocation5], %s939_s23 }
  0x5b   : > { %v292_v4 = vcombine.high %v290_v3, %v290_v3  ;;  %v295_v5 = vsel %vm294_vm0, %v290_v3, 0.0  ;;  %s277_s30 = scalar_lea.vmem %s1013_s2, %s527_s11  ;;  %s674_s24 = scalar_lea.vmem %s964_s19, 16 }
  0x5c   : > { %v296_v6 = vrot.slane %v295_v5, 4  ;;  %v325_v24 = vld [vmem:[%s277_s30] sm:$0x3]  ;;  %p675_p0 = scmp.ne.s32.totalorder %s964_s19, %s674_s24  ;;  %p1027_p7 = scmp.ne.s32.totalorder %s1019_s25, 0 }
  0x5d   : > { %v302_v7 = vsel %vm294_vm0, %v292_v4, 0.0  ;;  %v331_v29 = vrot.slane %v325_v24, %v330_v23  ;;  %v335_v34 = vrot.slane %v325_v24, %v334_v25  ;;  %s764_s15 = smov [#allocation8]  }
  0x5e   : > { %v297_v8 = vadd.f32 %v296_v6, %v295_v5  ;;  %v303_v9 = vrot.slane %v302_v7, 4  ;;  %p676_p4 = pnand %p675_p0, %p1027_p7  ;;  %s678_s11 = sshll.u32 %s764_s15, 4  ;;  %s679_s11 = int_to_ptr.vmem [resolvable:$false] %s678_s11 }
  0x5f   : > { %v357_v42 = vsel %vm340_vm5, %v331_v29, 0.0  ;;  %v358_v43 = vsel %vm340_vm5, %v335_v34, 0.0  ;;  %s680_s4 = scalar_lea.vmem %s679_s11, 32  ;;  %p681_p12 = scmp.lt.s32.totalorder %s964_s19, %s679_s11 }
  0x60   : > { %v298_v10 = vrot.slane %v297_v8, 2  ;;  %v304_v11 = vadd.f32 %v303_v9, %v302_v7  ;;  %v359_v45 = vadd.f32 %v358_v43, %v357_v42  ;;  %p677_p10 = pneg %p676_p4  ;;  %p682_p1 = scmp.lt.s32.totalorder %s680_s4, %s674_s24 }
  0x62   : > { %v299_v12 = vadd.f32 %v298_v10, %v297_v8  ;;  %v305_v13 = vrot.slane %v304_v11, 2  ;;  %p683_p2 = por %p682_p1, %p681_p12 }
  0x64   : > { %v300_v14 = vrot.slane %v299_v12, 1  ;;  %v306_v15 = vadd.f32 %v305_v13, %v304_v11  ;;  %p684_p9 = pnand %p683_p2, %p677_p10 }
  0x66   : > { %v301_v16 = vadd.f32 %v300_v14, %v299_v12  ;;  %v307_v17 = vrot.slane %v306_v15, 1 }
  0x68   : > { %v308_v18 = vadd.f32 %v307_v17, %v306_v15  ;;  %v309_v19 = vadd.f32 1e-08, %v301_v16 }
  0x6a   : > { %v310_v21 = vadd.f32 1e-08, %v308_v18  ;;  %608 = vrsqrt.f32 %v309_v19  ;;  %vm313_vm1 = vcmp.eq.f32.partialorder %v309_v19, inf  ;;  %v316_v27 = vand.u32 2147483648, %v309_v19 }
  0x6b   : > { %vm315_vm2 = vcmp.eq.f32.partialorder %v309_v19, 0.0 }
  0x6c   : > { %610 = vrsqrt.f32 %v310_v21  ;;  %vm320_vm3 = vcmp.eq.f32.partialorder %v310_v21, inf  ;;  %v323_v31 = vand.u32 2147483648, %v310_v21  ;;  %vm322_vm4 = vcmp.eq.f32.partialorder %v310_v21, 0.0 }
  0x74   : > { %v609_v26 = vpop.eup %608 }
  0x75   : > { %v312_v28 = vmul.f32 %v609_v26, %v309_v19 }
  0x76   : > { %v611_v30 = vpop.eup %610 }
  0x77   : > { %v314_v32 = vsel %vm313_vm1, %v309_v19, %v312_v28  ;;  %v319_v33 = vmul.f32 %v611_v30, %v310_v21 }
  0x78   : > { %v317_v35 = vsel %vm315_vm2, %v316_v27, %v314_v32 }
  0x79   : > { %v321_v36 = vsel %vm320_vm3, %v310_v21, %v319_v33  ;;  %v338_v37 = vmul.f32 %v331_v29, %v317_v35 }
  0x7a   : > { %v324_v38 = vsel %vm322_vm4, %v323_v31, %v321_v36 }
  0x7b   : > { %v339_v39 = vmul.f32 %v335_v34, %v324_v38  ;;  %v341_v40 = vsel %vm340_vm5, %v338_v37, 0.0 }
  0x7d   : > { %v342_v41 = vsel %vm340_vm5, %v339_v39, 0.0 }
  0x7e   : > { %v343_v44 = vadd.f32 %v342_v41, %v341_v40 }
  0x80   : > { %344 = vadd.xlane.f32.xlu0 %v343_v44 }
  0x84   : > { %360 = vadd.xlane.f32.xlu0 %v359_v45 }
 0x10d   : > { %v345_v46 = vpop.xlane.xlu0 %344 }
 0x10e   : > { %v346_v47 = vrot.slane %v345_v46, 4 }
 0x110   : > { %v347_v48 = vadd.f32 %v346_v47, %v345_v46 }
 0x111   : > { %v361_v49 = vpop.xlane.xlu0 %360 }
 0x112   : > { %v348_v50 = vrot.slane %v347_v48, 2  ;;  %v362_v51 = vrot.slane %v361_v49, 4 }
 0x114   : > { %v363_v52 = vadd.f32 %v362_v51, %v361_v49  ;;  %v349_v53 = vadd.f32 %v348_v50, %v347_v48 }
 0x116   : > { %v364_v54 = vrot.slane %v363_v52, 2  ;;  %v350_v55 = vrot.slane %v349_v53, 1 }
 0x118   : > { %v365_v56 = vadd.f32 %v364_v54, %v363_v52  ;;  %v351_v57 = vadd.f32 %v350_v55, %v349_v53 }
 0x11a   : > { %535 = vpush %v351_v57  ;;  %v366_v58 = vrot.slane %v365_v56, 1 }
 0x11c   : > { %v367_v59 = vadd.f32 %v366_v58, %v365_v56 }
 0x11e   : > { %537 = vpush %v367_v59 }
 0x14b   : > { %s536_s7 = spop %535 }
 0x14f   : > { %s538_s18 = spop %537 }
 0x150   : > { %v377_v60 = vstv %s538_s18 }
 0x151   : > { %612 = vrcp.f32 %v377_v60 }
 0x15b   : > { %v613_v61 = vpop.eup %612 }
 0x15c   : > { %539 = vpush %v613_v61 }
 0x18d   : > { %s540_s21 = spop %539 }
 0x18e   : > { %s380_s8 = smul.f32 %s540_s21, %s536_s7 }
 0x190   : > { %v381_v62 = vstv %s380_s8 }
 0x191   : > { %382 = vst [vmem:[%s267_s29] sm:$0x1] %v381_v62 }
 0x192   : > { %687 = shalt.err (!%p684_p9)
}
 0x193   : > { %s688_s23 = scalar_lea.hbm %s962_s9, 16  ;;  %s692_s7 = scalar_lea.hbm %s1014_s3, 32 }
 0x194   : > { %p689_p11 = scmp.ne.s32.totalorder %s962_s9, %s688_s23  ;;  %p693_p13 = scmp.lt.u32.totalorder %s962_s9, %s1014_s3 }
 0x195   : > { %p694_p5 = scmp.lt.u32.totalorder %s692_s7, %s688_s23  ;;  %p696_p0 = scmp.lt.u32.totalorder %s688_s23, %s962_s9 }
 0x196   : > { %p690_p3 = pnand %p689_p11, %p1027_p7 }
 0x197   : > { %p695_p8 = por %p694_p5, %p693_p13 }
 0x198   : > { %p691_p6 = pneg %p690_p3 }
 0x199   : > { %p697_p4 = por %p696_p0, %p695_p8 }
 0x19b   : > { %p698_p10 = pnand %p697_p4, %p691_p6 }
 0x19d   : > { %701 = shalt.err (!%p698_p10)
}
 0x19e   : > { %545 = dma.vmem_to_hbm [thread:$0]  (%p1027_p7), %s964_s19, 16, %s962_s9, %s384_s22  }
 0x19f PF: > { %s408_s29 = sand.u32 1, %s740_s12   ;;  %p1028_p12 = scmp.ne.s32.totalorder %s1020_s27, 0 }
 0x1a0   : > { %p1029_p1 = scmp.ge.s32.totalorder %s760_s17, 2  ;;  %s409_s21 = scalar_lea.sflag [#allocation5], %s408_s29 }
 0x1a2   : > { %p555_p2 = pnand %p1029_p1, %p1028_p12 }
 0x1a4   : > { %735 = dma.done.wait (!%p555_p2), %s409_s21, 16  }
 0x1a5   : > { %737 = vsyncadd (!%p555_p2), %s409_s21, 4294967280  ;;  %s22_s17 = sadd.s32 1, %s760_s17   ;;  %s1030_s12 = smov %s744_s13 }
 0x1a6   : > { %p19_p9 = scmp.ge.s32.totalorder %s22_s17, 4   ;;  %s1031_s13 = smov %s748_s14 }
 0x1a7   : > { %s1032_s14 = smov %s841_s26  ;;  %s1033_s15 = smov %s756_s16 }
 0x1a8   : > { %s1034_s16 = smov %s1036_s20  ;;  %21 = sbr.rel (!%p19_p9) target bundleno = 8 (0x8), region = 105 }
 0x1af   :  { %413 = vsyncpa [#allocation4], 1 }
 0x1b0   :  { %415 = vsyncpa [#allocation4 + $0x1], 1 }
 0x1b1   :  { %416 = vsyncpa [#allocation7], 1 }
 0x1b2   :  { %418 = vsyncpa [#allocation7 + $0x1], 1 }
 0x1b3   :  { %419 = vsyncpa [#allocation5], 1 }
 0x1b4   :  { %421 = vsyncpa [#allocation5 + $0x1], 1 }

</bundles_post_ra>
